<compile_context>
chip_gen: v5e
topology: v5e:2x2
jax: 0.10.0
libtpu: 0.0.40
codegen_flags: <defaults>
</compile_context>

<pallas_src>
import jax
import jax.numpy as jnp
from jax.experimental import pallas as pl
from jax.experimental.pallas import tpu as pltpu

C_COND = 32   # channels of the condition branch (x[1])
C_FEAT = 64   # channels of the feature branch (x[0]) and of the output


def _leaky_relu(x, neg_slope=0.1):
    return jnp.where(x > 0, x, neg_slope * x)


def cfm_kernel(feat_ref, cond_ref, w0_ref, b0_ref,
               ws1_ref, bs1_ref, wh1_ref, bh1_ref, out_ref):
    # feat_ref/out_ref: (bn, 64, T)     cond_ref: (bn, 32, T)
    # w0: (64, 32) = [ws0; wh0]         b0: (64, 1) = [bs0; bh0]
    # ws1/wh1: (64, 32)                 bs1: (64, 1) = bs1 + 1   bh1: (64, 1)
    w0 = w0_ref[...]
    b0 = b0_ref[...]
    ws1 = ws1_ref[...]
    bs1 = bs1_ref[...]
    wh1 = wh1_ref[...]
    bh1 = bh1_ref[...]

    bn = cond_ref.shape[0]
    for i in range(bn):  # static, small (bn*T <= tile_hw lanes per step)
        cond = cond_ref[i].astype(jnp.float32)                         # (32, T)
        # fused first layer for both branches: (64,32)@(32,T) -> (64,T)
        h = jnp.dot(w0, cond, preferred_element_type=jnp.float32) + b0
        h = _leaky_relu(h)
        # separate second layers (scale uses h[:32], shift uses h[32:])
        scale_p1 = jnp.dot(ws1, h[:C_COND, :],
                           preferred_element_type=jnp.float32) + bs1   # +1 folded
        shift = jnp.dot(wh1, h[C_COND:, :],
                        preferred_element_type=jnp.float32) + bh1
        feat = feat_ref[i].astype(jnp.float32)
        out_ref[i] = (feat * scale_p1 + shift).astype(out_ref.dtype)


def pack_params(params):
    """Pack the 4 convs (PyTorch (out,in) layout) into the kernel operands."""
    ws0, bs0, ws1, bs1, wh0, bh0, wh1, bh1 = params
    w0 = jnp.concatenate([ws0, wh0], axis=0).astype(jnp.float32)         # (64, 32)
    b0 = jnp.concatenate([bs0, bh0]).reshape(2 * C_COND, 1).astype(jnp.float32)
    ws1_p = ws1.astype(jnp.float32)                                      # (64, 32)
    bs1_p = (bs1 + 1.0).reshape(C_FEAT, 1).astype(jnp.float32)           # fold +1
    wh1_p = wh1.astype(jnp.float32)                                      # (64, 32)
    bh1_p = bh1.reshape(C_FEAT, 1).astype(jnp.float32)
    return w0, b0, ws1_p, bs1_p, wh1_p, bh1_p


def cfm_layer(feat_nchw, cond_nchw, params, *, tile_hw=8192):
    """feat_nchw: (N, 64, H, W), cond_nchw: (N, 32, H, W) -> (N, 64, H, W)."""
    N, Cf, H, W = feat_nchw.shape
    _, Cc, _, _ = cond_nchw.shape
    assert Cf == C_FEAT and Cc == C_COND

    hw = H * W
    feat = feat_nchw.reshape(N, Cf, hw)   # free reshape, stays channel-major
    cond = cond_nchw.reshape(N, Cc, hw)

    # ---- spatial tiling: ~even divisor of hw, multiple of 128 lanes ----
    n_sp = pl.cdiv(hw, tile_hw)
    if N * n_sp < 2 and hw >= 256:
        n_sp = 2                              # give v7x's two TensorCores work
    tile = ((pl.cdiv(hw, n_sp) + 127) // 128) * 128
    if tile >= hw:
        tile = hw                             # full-extent last-dim block
    n_sp = pl.cdiv(hw, tile)

    # ---- batch grouping: keep per-step DMAs large on small images ----
    bn = max(1, min(N, tile_hw // max(tile, 1)))
    if pl.cdiv(N, bn) * n_sp < 2 and N >= 2:
        bn = pl.cdiv(N, 2)                    # keep >= 2 grid steps
    n_b = pl.cdiv(N, bn)
    grid = (n_b, n_sp)

    w0, b0, ws1, bs1, wh1, bh1 = pack_params(params)

    def tile_spec(c):
        return pl.BlockSpec((bn, c, tile), lambda n, j: (n, 0, j))

    def full_spec(shape):
        return pl.BlockSpec(shape, lambda n, j: (0, 0))

    itemsize = jnp.dtype(feat_nchw.dtype).itemsize
    # double-buffered IO + generous f32 intermediates, clamped to [32, 48] MiB
    io_bytes = 2 * bn * tile * (2 * C_FEAT + C_COND) * itemsize
    scratch_bytes = 8 * bn * tile * C_FEAT * 4
    vmem_limit = int(min(48 << 20, max(32 << 20, (io_bytes + scratch_bytes) * 3 // 2)))

    cost = pl.CostEstimate(
        flops=int(N) * int(hw)
        * (2 * (2 * C_COND) * C_COND + 2 * 2 * C_FEAT * C_COND + 5 * C_FEAT),
        transcendentals=0,
        bytes_accessed=int(N) * int(hw) * (2 * C_FEAT + C_COND) * itemsize,
    )

    out = pl.pallas_call(
        cfm_kernel,
        out_shape=jax.ShapeDtypeStruct((N, C_FEAT, hw), feat_nchw.dtype),
        grid_spec=pltpu.PrefetchScalarGridSpec(
            num_scalar_prefetch=0,
            grid=grid,
            in_specs=[
                tile_spec(C_FEAT),                    # feat   (bn, 64, T)
                tile_spec(C_COND),                    # cond   (bn, 32, T)
                full_spec((2 * C_COND, C_COND)),      # w0     (64, 32)
                full_spec((2 * C_COND, 1)),           # b0     (64, 1)
                full_spec((C_FEAT, C_COND)),          # ws1    (64, 32)
                full_spec((C_FEAT, 1)),               # bs1+1  (64, 1)
                full_spec((C_FEAT, C_COND)),          # wh1    (64, 32)
                full_spec((C_FEAT, 1)),               # bh1    (64, 1)
            ],
            out_specs=tile_spec(C_FEAT),
        ),
        compiler_params=pltpu.CompilerParams(
            dimension_semantics=("parallel", "parallel"),
            vmem_limit_bytes=vmem_limit),
        cost_estimate=cost,
    )(feat, cond, w0, b0, ws1, bs1, wh1, bh1)

    return out.reshape(N, C_FEAT, H, W)


def init_params(key):
    """Deterministic params in PyTorch nn.Conv2d(.., .., 1) layout: W (out,in), b (out,)."""
    ks = jax.random.split(key, 8)
    s = 0.05
    ws0 = jax.random.normal(ks[0], (C_COND, C_COND), jnp.float32) * s
    bs0 = jax.random.normal(ks[1], (C_COND,), jnp.float32) * s
    ws1 = jax.random.normal(ks[2], (C_FEAT, C_COND), jnp.float32) * s
    bs1 = jax.random.normal(ks[3], (C_FEAT,), jnp.float32) * s
    wh0 = jax.random.normal(ks[4], (C_COND, C_COND), jnp.float32) * s
    bh0 = jax.random.normal(ks[5], (C_COND,), jnp.float32) * s
    wh1 = jax.random.normal(ks[6], (C_FEAT, C_COND), jnp.float32) * s
    bh1 = jax.random.normal(ks[7], (C_FEAT,), jnp.float32) * s
    return ws0, bs0, ws1, bs1, wh0, bh0, wh1, bh1


def cfm_reference(feat_nchw, cond_nchw, params):
    """Pure-JAX reference with the original (unfused, unfolded) semantics."""
    ws0, bs0, ws1, bs1, wh0, bh0, wh1, bh1 = params

    def conv1x1(x, w, b):
        return (jnp.einsum('oi,nihw->nohw', w, x,
                           precision=jax.lax.Precision.HIGHEST)
                + b[None, :, None, None])

    hs = _leaky_relu(conv1x1(cond_nchw, ws0, bs0))
    scale = conv1x1(hs, ws1, bs1)
    hh = _leaky_relu(conv1x1(cond_nchw, wh0, bh0))
    shift = conv1x1(hh, wh1, bh1)
    return feat_nchw * (scale + 1.0) + shift


if __name__ == "__main__":
    key = jax.random.PRNGKey(0)
    k_feat, k_cond, k_param = jax.random.split(key, 3)
    params = init_params(k_param)

    # 1) main check: N=2, 16x16, f32 (grid (2,1): two steps for v7x megacore)
    N, H, W = 2, 16, 16
    feat = jax.random.normal(k_feat, (N, C_FEAT, H, W), jnp.float32)   # x[0]
    cond = jax.random.normal(k_cond, (N, C_COND, H, W), jnp.float32)   # x[1]
    out = jax.block_until_ready(cfm_layer(feat, cond, params))
    ref = cfm_reference(feat, cond, params)
    assert out.shape == (N, C_FEAT, H, W)
    assert jnp.allclose(out, ref, atol=2e-4, rtol=2e-4), \
        float(jnp.max(jnp.abs(out - ref)))

    # 2) ragged spatial last block: H*W=400 split into two 256-lane tiles
    f2 = jax.random.normal(k_feat, (1, C_FEAT, 20, 20), jnp.float32)
    c2 = jax.random.normal(k_cond, (1, C_COND, 20, 20), jnp.float32)
    o2 = jax.block_until_ready(cfm_layer(f2, c2, params))
    r2 = cfm_reference(f2, c2, params)
    assert jnp.allclose(o2, r2, atol=2e-4, rtol=2e-4), \
        float(jnp.max(jnp.abs(o2 - r2)))

    # 3) ragged batch block: N=3 grouped as bn=2 (grid (2,1))
    f3 = jax.random.normal(k_feat, (3, C_FEAT, H, W), jnp.float32)
    c3 = jax.random.normal(k_cond, (3, C_COND, H, W), jnp.float32)
    o3 = jax.block_until_ready(cfm_layer(f3, c3, params))
    r3 = cfm_reference(f3, c3, params)
    assert jnp.allclose(o3, r3, atol=2e-4, rtol=2e-4), \
        float(jnp.max(jnp.abs(o3 - r3)))

    # 4) bf16 streaming (halves HBM traffic; compute stays f32 in-kernel)
    fb = feat.astype(jnp.bfloat16)
    cb = cond.astype(jnp.bfloat16)
    ob = jax.block_until_ready(cfm_layer(fb, cb, params))
    rb = cfm_reference(fb.astype(jnp.float32), cb.astype(jnp.float32), params)
    assert ob.dtype == jnp.bfloat16
    assert jnp.allclose(ob.astype(jnp.float32), rb, atol=0.06, rtol=0.06), \
        float(jnp.max(jnp.abs(ob.astype(jnp.float32) - rb)))

    print("KERNEL_OK")
</pallas_src>

<mosaic_0001>
module attributes {stable_mosaic.version = 11 : i64} {
  func.func @cfm_kernel(%arg0: i32, %arg1: i32, %arg2: memref<1x64x256xf32, #tpu.memory_space<vmem>>, %arg3: memref<1x32x256xf32, #tpu.memory_space<vmem>>, %arg4: memref<64x32xf32, #tpu.memory_space<vmem>>, %arg5: memref<64x1xf32, #tpu.memory_space<vmem>>, %arg6: memref<64x32xf32, #tpu.memory_space<vmem>>, %arg7: memref<64x1xf32, #tpu.memory_space<vmem>>, %arg8: memref<64x32xf32, #tpu.memory_space<vmem>>, %arg9: memref<64x1xf32, #tpu.memory_space<vmem>>, %arg10: memref<1x64x256xf32, #tpu.memory_space<vmem>>) attributes {dimension_semantics = [#tpu.dimension_semantics<parallel>, #tpu.dimension_semantics<parallel>], iteration_bounds = array<i64: 2, 1>, scalar_prefetch = 0 : i64, scratch_operands = 0 : i64, tpu.core_type = #tpu.core_type<tc>, window_params = [{transform_indices = @transform_0, window_bounds = array<i64: 1, 64, 256>}, {transform_indices = @transform_1, window_bounds = array<i64: 1, 32, 256>}, {pipeline_mode = #tpu.pipeline_mode<synchronous>, transform_indices = @transform_2, window_bounds = array<i64: 64, 32>}, {pipeline_mode = #tpu.pipeline_mode<synchronous>, transform_indices = @transform_3, window_bounds = array<i64: 64, 1>}, {pipeline_mode = #tpu.pipeline_mode<synchronous>, transform_indices = @transform_4, window_bounds = array<i64: 64, 32>}, {pipeline_mode = #tpu.pipeline_mode<synchronous>, transform_indices = @transform_5, window_bounds = array<i64: 64, 1>}, {pipeline_mode = #tpu.pipeline_mode<synchronous>, transform_indices = @transform_6, window_bounds = array<i64: 64, 32>}, {pipeline_mode = #tpu.pipeline_mode<synchronous>, transform_indices = @transform_7, window_bounds = array<i64: 64, 1>}, {transform_indices = @transform_8, window_bounds = array<i64: 1, 64, 256>}]} {
    %c0 = arith.constant 0 : index
    %c0_0 = arith.constant 0 : index
    %0 = vector.load %arg4[%c0, %c0_0] : memref<64x32xf32, #tpu.memory_space<vmem>>, vector<64x32xf32>
    %c0_1 = arith.constant 0 : index
    %c0_2 = arith.constant 0 : index
    %1 = vector.load %arg5[%c0_1, %c0_2] : memref<64x1xf32, #tpu.memory_space<vmem>>, vector<64x1xf32>
    %c0_3 = arith.constant 0 : index
    %c0_4 = arith.constant 0 : index
    %2 = vector.load %arg6[%c0_3, %c0_4] : memref<64x32xf32, #tpu.memory_space<vmem>>, vector<64x32xf32>
    %c0_5 = arith.constant 0 : index
    %c0_6 = arith.constant 0 : index
    %3 = vector.load %arg7[%c0_5, %c0_6] : memref<64x1xf32, #tpu.memory_space<vmem>>, vector<64x1xf32>
    %c0_7 = arith.constant 0 : index
    %c0_8 = arith.constant 0 : index
    %4 = vector.load %arg8[%c0_7, %c0_8] : memref<64x32xf32, #tpu.memory_space<vmem>>, vector<64x32xf32>
    %c0_9 = arith.constant 0 : index
    %c0_10 = arith.constant 0 : index
    %5 = vector.load %arg9[%c0_9, %c0_10] : memref<64x1xf32, #tpu.memory_space<vmem>>, vector<64x1xf32>
    %c0_11 = arith.constant 0 : index
    %c0_12 = arith.constant 0 : index
    %c0_13 = arith.constant 0 : index
    %6 = vector.load %arg3[%c0_11, %c0_12, %c0_13] : memref<1x32x256xf32, #tpu.memory_space<vmem>>, vector<1x32x256xf32>
    %7 = vector.shape_cast %6 : vector<1x32x256xf32> to vector<32x256xf32>
    %cst = arith.constant dense<0.000000e+00> : vector<64x256xf32>
    %8 = tpu.matmul %0, %7, %cst {dimension_numbers = #tpu.dot_dimension_numbers<[1], [0], [0], [1], [0, 0, 1, 1], [], []>} : vector<64x32xf32>, vector<32x256xf32>, vector<64x256xf32> -> vector<64x256xf32>
    %9 = vector.broadcast %1 : vector<64x1xf32> to vector<64x256xf32>
    %10 = arith.addf %8, %9 : vector<64x256xf32>
    %cst_14 = arith.constant 0.000000e+00 : f32
    %11 = vector.broadcast %cst_14 : f32 to vector<64x256xf32>
    %12 = arith.cmpf ogt, %10, %11 : vector<64x256xf32>
    %cst_15 = arith.constant 1.000000e-01 : f32
    %13 = vector.broadcast %cst_15 : f32 to vector<64x256xf32>
    %14 = arith.mulf %13, %10 : vector<64x256xf32>
    %15 = arith.select %12, %10, %14 : vector<64x256xi1>, vector<64x256xf32>
    %16 = vector.extract_strided_slice %15 {offsets = [0, 0], sizes = [32, 256], strides = [1, 1]} : vector<64x256xf32> to vector<32x256xf32>
    %cst_16 = arith.constant dense<0.000000e+00> : vector<64x256xf32>
    %17 = tpu.matmul %2, %16, %cst_16 {dimension_numbers = #tpu.dot_dimension_numbers<[1], [0], [0], [1], [0, 0, 1, 1], [], []>} : vector<64x32xf32>, vector<32x256xf32>, vector<64x256xf32> -> vector<64x256xf32>
    %18 = vector.broadcast %3 : vector<64x1xf32> to vector<64x256xf32>
    %19 = arith.addf %17, %18 : vector<64x256xf32>
    %20 = vector.extract_strided_slice %15 {offsets = [32, 0], sizes = [32, 256], strides = [1, 1]} : vector<64x256xf32> to vector<32x256xf32>
    %cst_17 = arith.constant dense<0.000000e+00> : vector<64x256xf32>
    %21 = tpu.matmul %4, %20, %cst_17 {dimension_numbers = #tpu.dot_dimension_numbers<[1], [0], [0], [1], [0, 0, 1, 1], [], []>} : vector<64x32xf32>, vector<32x256xf32>, vector<64x256xf32> -> vector<64x256xf32>
    %22 = vector.broadcast %5 : vector<64x1xf32> to vector<64x256xf32>
    %23 = arith.addf %21, %22 : vector<64x256xf32>
    %c0_18 = arith.constant 0 : index
    %c0_19 = arith.constant 0 : index
    %c0_20 = arith.constant 0 : index
    %24 = vector.load %arg2[%c0_18, %c0_19, %c0_20] : memref<1x64x256xf32, #tpu.memory_space<vmem>>, vector<1x64x256xf32>
    %25 = vector.shape_cast %24 : vector<1x64x256xf32> to vector<64x256xf32>
    %26 = arith.mulf %25, %19 : vector<64x256xf32>
    %27 = arith.addf %26, %23 : vector<64x256xf32>
    %c0_21 = arith.constant 0 : index
    %c0_22 = arith.constant 0 : index
    %c0_23 = arith.constant 0 : index
    %28 = vector.load %arg10[%c0_21, %c0_22, %c0_23] : memref<1x64x256xf32, #tpu.memory_space<vmem>>, vector<1x64x256xf32>
    %29 = vector.shape_cast %28 : vector<1x64x256xf32> to vector<64x256xf32>
    %30 = vector.shape_cast %27 : vector<64x256xf32> to vector<1x64x256xf32>
    tpu.vector_store %arg10[%c0_21, %c0_22, %c0_23], %30 {strides = array<i32>} : memref<1x64x256xf32, #tpu.memory_space<vmem>>, vector<1x64x256xf32>,
    return
  }
  func.func @transform_0(%arg0: i32, %arg1: i32) -> (i32, i32, i32) {
    %c0_i32 = arith.constant 0 : i32
    %c0_i32_0 = arith.constant 0 : i32
    return %arg0, %c0_i32, %arg1 : i32, i32, i32
  }
  func.func @transform_1(%arg0: i32, %arg1: i32) -> (i32, i32, i32) {
    %c0_i32 = arith.constant 0 : i32
    %c0_i32_0 = arith.constant 0 : i32
    return %arg0, %c0_i32, %arg1 : i32, i32, i32
  }
  func.func @transform_2(%arg0: i32, %arg1: i32) -> (i32, i32) {
    %c0_i32 = arith.constant 0 : i32
    %c0_i32_0 = arith.constant 0 : i32
    %c0_i32_1 = arith.constant 0 : i32
    return %c0_i32, %c0_i32_0 : i32, i32
  }
  func.func @transform_3(%arg0: i32, %arg1: i32) -> (i32, i32) {
    %c0_i32 = arith.constant 0 : i32
    %c0_i32_0 = arith.constant 0 : i32
    %c0_i32_1 = arith.constant 0 : i32
    return %c0_i32, %c0_i32_0 : i32, i32
  }
  func.func @transform_4(%arg0: i32, %arg1: i32) -> (i32, i32) {
    %c0_i32 = arith.constant 0 : i32
    %c0_i32_0 = arith.constant 0 : i32
    %c0_i32_1 = arith.constant 0 : i32
    return %c0_i32, %c0_i32_0 : i32, i32
  }
  func.func @transform_5(%arg0: i32, %arg1: i32) -> (i32, i32) {
    %c0_i32 = arith.constant 0 : i32
    %c0_i32_0 = arith.constant 0 : i32
    %c0_i32_1 = arith.constant 0 : i32
    return %c0_i32, %c0_i32_0 : i32, i32
  }
  func.func @transform_6(%arg0: i32, %arg1: i32) -> (i32, i32) {
    %c0_i32 = arith.constant 0 : i32
    %c0_i32_0 = arith.constant 0 : i32
    %c0_i32_1 = arith.constant 0 : i32
    return %c0_i32, %c0_i32_0 : i32, i32
  }
  func.func @transform_7(%arg0: i32, %arg1: i32) -> (i32, i32) {
    %c0_i32 = arith.constant 0 : i32
    %c0_i32_0 = arith.constant 0 : i32
    %c0_i32_1 = arith.constant 0 : i32
    return %c0_i32, %c0_i32_0 : i32, i32
  }
  func.func @transform_8(%arg0: i32, %arg1: i32) -> (i32, i32, i32) {
    %c0_i32 = arith.constant 0 : i32
    %c0_i32_0 = arith.constant 0 : i32
    return %arg0, %c0_i32, %arg1 : i32, i32, i32
  }
}

</mosaic_0001>

<bundles_post_ra>
// kernel: tpu_custom_call.1
= control target key start
LH: loop header
LB: loop body
LE: loop exit
PB: predicated region body
PF: predicated region fallthrough
CT: control target
= control target key end

     0   :  { %13 = vsyncpa [#allocation3], 0  ;;  %s1724_s0 = inlined_call_operand.vmem [shape: f32[2,64,256], index: 0, kind: input, shape index: {}]   ;;  %s1725_s1 = inlined_call_operand.vmem [shape: f32[2,32,256], index: 1, kind: input, shape index: {}]   ;;  %s1726_s2 = inlined_call_operand.vmem [shape: f32[64,32], index: 2, kind: input, shape index: {}]   ;;  %s1727_s3 = inlined_call_operand.vmem [shape: f32[64,1], index: 3, kind: input, shape index: {}]   ;;  %s1728_s4 = inlined_call_operand.vmem [shape: f32[64,32], index: 4, kind: input, shape index: {}]   ;;  %s1729_s5 = inlined_call_operand.vmem [shape: f32[64,1], index: 5, kind: input, shape index: {}]   ;;  %s1730_s6 = inlined_call_operand.vmem [shape: f32[64,32], index: 6, kind: input, shape index: {}]   ;;  %s1731_s7 = inlined_call_operand.vmem [shape: f32[64,1], index: 7, kind: input, shape index: {}]   ;;  %s1732_s8 = inlined_call_operand.hbm [shape: f32[2,64,256], index: 8, kind: output, shape index: {}]  }
   0x1   :  { %15 = vsyncpa [#allocation3 + $0x1], 0  ;;  %s1356_s27 = smov 0   ;;  %s1358_s28 = smov 0  }
   0x2   :  { %s1360_s29 = smov 0   ;;  %s1362_s30 = smov 0  }
   0x3   :  { %s1364_s9 = smov 0   ;;  %s1366_s10 = smov 0  }
   0x4 LB: > { %s1093_s11 = sadd.s32 4294967295, %s1306_s10   ;;  %s1094_s12 = sadd.s32 4294967294, %s1306_s10   ;;  %s1306_s10 = sphi %s1366_s10, %s21_s10   ;;  %s1302_s9 = sphi %s1364_s9, %s1739_s9   ;;  %s1298_s30 = sphi %s1362_s30, %s1738_s30   ;;  %s1294_s29 = sphi %s1360_s29, %s1737_s29   ;;  %s1290_s28 = sphi %s1358_s28, %s1736_s28   ;;  %s1286_s27 = sphi %s1356_s27, %s1735_s27  }
   0x5   : > { %s33_s13 = sadd.s32 1, %s1302_s9  ;;  %s224_s14 = sadd.s32 1, %s1294_s29 }
   0x6   : > { %p35_p0 = scmp.ge.s32.totalorder %s33_s13, 2  ;;  %p234_p1 = scmp.ne.s32.totalorder %s1294_s29, %s1290_s28 }
   0x7   : > { %p235_p2 = scmp.eq.s32.totalorder %s1093_s11, 1  ;;  %p240_p3 = scmp.ne.s32.totalorder %s1290_s28, %s1286_s27 }
   0x8   : > { %s1741_s13 = smov (%p35_p0, %s33_s13), 0  ;;  %p241_p5 = scmp.eq.s32.totalorder %s1094_s12, 1 }
   0x9   : > { %p1396_p4 = por %p235_p2, %p234_p1  ;;  %s219_s16 = ssub.s32 %s1302_s9, %s1741_s13 }
   0xa   : > { %p1097_p6 = scmp.ge.s32.totalorder %s1306_s10, 1  ;;  %p222_p7 = scmp.eq.s32.totalorder %s219_s16, 0 }
   0xb   : > { %p1403_p8 = por %p241_p5, %p240_p3  ;;  %p303_p9 = scmp.lt.s32.totalorder %s1306_s10, 3 }
   0xc   : > { %s1409_s18 = scalar_select %p222_p7, %s1294_s29, %s224_s14  }
   0xd   : > { %p304_p10 = pnand %p1097_p6, %p303_p9 }
   0xe   : > { %p351_p11 = scmp.lt.s32.totalorder (!%p304_p10), %s1298_s30, 1  ;;  %s347_s25 = sand.u32 (!%p304_p10), 1, %s1290_s28  }
   0xf   : > { %307 = sbr.rel (%p304_p10) target bundleno = 395 (0x18b), region = 52  ;;  %s1158_s11 = sshll.u32 (!%p304_p10), %s1298_s30, 7 }
  0x10   : > { %s992_s16 = scalar_lea.hbm (!%p304_p10), %s1732_s8, %s1158_s11  ;;  %s1248_s11 = scalar_lea.hbm (!%p304_p10), %s1732_s8, 256 }
  0x11   : > { %s995_s19 = sshll.u32 (!%p304_p10), %s992_s16, 4  ;;  %s996_s19 = int_to_ptr.hbm [resolvable:$true] %s995_s19 }
  0x12   : > { %s1242_s21 = sshra.s32 (!%p304_p10), %s996_s19, 4  ;;  %s1243_s21 = int_to_ptr.hbm [resolvable:$true] %s1242_s21 }
  0x13   : > { %s1244_s22 = scalar_lea.hbm (!%p304_p10), %s1243_s21, 128  ;;  %p1249_p1 = scmp.lt.s32.totalorder (!%p304_p10), %s1243_s21, %s1732_s8 }
  0x14   : > { %v382_v0 = vld [vmem:[%s1727_s3 + $0x18] sm:$0xff]  ;;  %v380_v1 = vld [vmem:[%s1727_s3 + $0x8] sm:$0xff]  ;;  %v1308_v2 = vmov 0   ;;  %s1419_s23 = scalar_select %p351_p11, %s1298_s30, 1  ;;  %v381_v8 = vld [vmem:[%s1727_s3 + $0x10] sm:$0xff]  ;;  %vm467_vm0 = vcmask 261120  }
  0x15   : > { %1225 = vset.pattern.permute.xlu0 %v1308_v2  ;;  %1226 = vset.pattern.permute.xlu1 %v1308_v2  ;;  %v386_v3 = vld [vmem:[%s1727_s3 + $0x38] sm:$0xff]  ;;  %v371_v13 = vld [vmem:[%s1726_s2] sm:$0xff]  ;;  %v385_v16 = vld [vmem:[%s1727_s3 + $0x30] sm:$0xff]  ;;  %p1245_p12 = scmp.ne.s32.totalorder %s1243_s21, %s1244_s22  ;;  %p1250_p2 = scmp.lt.s32.totalorder %s1248_s11, %s1244_s22 }
  0x16   : > { %444 = vperm.xlu0 %1225, %v382_v0   ;;  %434 = vperm.xlu1 %1226, %v380_v1   ;;  %s1157_s26 = sshll.u32 %s1419_s23, 6  ;;  %v375_v14 = vld [vmem:[%s1726_s2 + $0x20] sm:$0xff]  ;;  %v384_v17 = vld [vmem:[%s1727_s3 + $0x28] sm:$0xff]  ;;  %v373_v23 = vld [vmem:[%s1726_s2 + $0x10] sm:$0xff]  ;;  %s1156_s20 = sshll.u32 %s1419_s23, 7 }
  0x17   : > { %1227 = vset.pattern.permute.xlu2 %v1308_v2  ;;  %s368_s14 = scalar_lea.vmem %s1725_s1, %s1157_s26  ;;  %v379_v15 = vld [vmem:[%s1727_s3] sm:$0xff]  ;;  %v372_v18 = vld [vmem:[%s1726_s2 + $0x8] sm:$0xff]  ;;  %v377_v24 = vld [vmem:[%s1726_s2 + $0x30] sm:$0xff]  ;;  %s1630_s24 = scalar_lea.vmem %s1724_s0, %s1156_s20 }
  0x18   : > { %464 = vperm.xlu2 %1227, %v386_v3   ;;  %v425_v4 = vld [vmem:[%s368_s14 + $0x30] sm:$0xff]  ;;  %v426_v5 = vld [vmem:[%s368_s14 + $0x38] sm:$0xff]  ;;  %v423_v6 = vld [vmem:[%s368_s14 + $0x20] sm:$0xff]  ;;  %s1098_s23 = sshll.u32 %s347_s25, 7  ;;  %s979_s20 = scalar_lea.sflag [#allocation3], %s347_s25 }
  0x19   : > { %504 = vmatpush.msra.mxu0 %v425_v4  ;;  %1159 = vmatpush.msra.mxu2 %v425_v4  ;;  %v424_v7 = vld [vmem:[%s368_s14 + $0x28] sm:$0xff]  ;;  %v421_v9 = vld [vmem:[%s368_s14 + $0x10] sm:$0xff]  ;;  %v422_v10 = vld [vmem:[%s368_s14 + $0x18] sm:$0xff]  ;;  %s1643_s26 = scalar_lea.vmem [#allocation2], %s1098_s23  ;;  %p1246_p13 = pnand %p1245_p12, %p1396_p4 }
  0x1a   : > { %545 = vmatpush.msra.mxu1 %v426_v5  ;;  %1163 = vmatpush.msra.mxu3 %v426_v5  ;;  %v419_v11 = vld [vmem:[%s368_s14] sm:$0xff]  ;;  %v420_v12 = vld [vmem:[%s368_s14 + $0x8] sm:$0xff]  ;;  %v397_v25 = vld [vmem:[%s1729_s5 + $0x10] sm:$0xff]  ;;  %s993_s30 = sshll.u32 %s1643_s26, 4  ;;  %p1251_p3 = por %p1250_p2, %p1249_p1  ;;  %s994_s30 = int_to_ptr.vmem [resolvable:$true] %s993_s30 }
  0x1b   : > { %505 = vmatpush.msra.mxu0 %v423_v6  ;;  %1160 = vmatpush.msra.mxu2 %v423_v6  ;;  %v376_v19 = vld [vmem:[%s1726_s2 + $0x28] sm:$0xff]  ;;  %v383_v20 = vld [vmem:[%s1727_s3 + $0x20] sm:$0xff]  ;;  %v398_v26 = vld [vmem:[%s1729_s5 + $0x18] sm:$0xff]  ;;  %p1247_p0 = pneg %p1246_p13 }
  0x1c   : > { %546 = vmatpush.msra.mxu1 %v424_v7  ;;  %1164 = vmatpush.msra.mxu3 %v424_v7  ;;  %v395_v21 = vld [vmem:[%s1729_s5] sm:$0xff]  ;;  %v396_v22 = vld [vmem:[%s1729_s5 + $0x8] sm:$0xff]  ;;  %v374_v28 = vld [vmem:[%s1726_s2 + $0x18] sm:$0xff] }
  0x1d   : > { %506 = vmatpush.msra.mxu0 %v421_v9  ;;  %1161 = vmatpush.msra.mxu2 %v421_v9  ;;  %v399_v27 = vld [vmem:[%s1729_s5 + $0x20] sm:$0xff]  ;;  %v378_v29 = vld [vmem:[%s1726_s2 + $0x38] sm:$0xff]  ;;  %v400_v30 = vld [vmem:[%s1729_s5 + $0x28] sm:$0xff]  ;;  %p1252_p5 = pnand %p1251_p3, %p1247_p0 }
  0x1e   : > { %439 = vperm.xlu0 %1225, %v381_v8   ;;  %547 = vmatpush.msra.mxu1 %v422_v10  ;;  %v401_v31 = vld [vmem:[%s1729_s5 + $0x30] sm:$0xff]  ;;  %v402_v32 = vld [vmem:[%s1729_s5 + $0x38] sm:$0xff]  ;;  %v411_v33 = vld [vmem:[%s1731_s7] sm:$0xff] }
  0x1f   : > { %1165 = vmatpush.msra.mxu3 %v422_v10  ;;  %507 = vmatpush.msra.mxu0 %v419_v11  ;;  %v412_v34 = vld [vmem:[%s1731_s7 + $0x8] sm:$0xff]  ;;  %v413_v35 = vld [vmem:[%s1731_s7 + $0x10] sm:$0xff]  ;;  %v414_v36 = vld [vmem:[%s1731_s7 + $0x18] sm:$0xff] }
  0x20   : > { %1162 = vmatpush.msra.mxu2 %v419_v11  ;;  %548 = vmatpush.msra.mxu1 %v420_v12  ;;  %v415_v37 = vld [vmem:[%s1731_s7 + $0x20] sm:$0xff]  ;;  %v416_v38 = vld [vmem:[%s1731_s7 + $0x28] sm:$0xff]  ;;  %v417_v39 = vld [vmem:[%s1731_s7 + $0x30] sm:$0xff] }
  0x21   : > { %1166 = vmatpush.msra.mxu3 %v420_v12  ;;  %1103 = vmatmul.msk.f32.vlgmr.msra.gmra.mxu0 %vm467_vm0, %v371_v13  ;;  %v418_v40 = vld [vmem:[%s1731_s7 + $0x38] sm:$0xff] }
  0x22   : > { %1107 = vmatmul.msk.f32.vlgmr.msra.gmra.mxu2 %vm467_vm0, %v375_v14  ;;  %1111 = vmatmul.msk.f32.vlgmr.msra.gmra.mxu1 %vm467_vm0, %v371_v13 }
  0x23   : > { %1115 = vmatmul.msk.f32.vlgmr.msra.gmra.mxu3 %vm467_vm0, %v375_v14  ;;  %429 = vperm.xlu1 %1226, %v379_v15  }
  0x24   : > { %459 = vperm.xlu2 %1227, %v385_v16  }
  0x26   : > { %454 = vperm.xlu0 %1225, %v384_v17  }
  0x29   : > { %1104 = vmatmul.msk.f32.gmra.mxu0 %vm467_vm0, %v372_v18 }
  0x2a   : > { %1108 = vmatmul.msk.f32.gmra.mxu2 %vm467_vm0, %v376_v19  ;;  %1112 = vmatmul.msk.f32.gmra.mxu1 %vm467_vm0, %v372_v18 }
  0x2b   : > { %1116 = vmatmul.msk.f32.gmra.mxu3 %vm467_vm0, %v376_v19  ;;  %449 = vperm.xlu1 %1226, %v383_v20  }
  0x2c   : > { %624 = vperm.xlu2 %1227, %v395_v21  }
  0x2e   : > { %629 = vperm.xlu0 %1225, %v396_v22  }
  0x31   : > { %1105 = vmatmul.msk.f32.gmra.mxu0 %vm467_vm0, %v373_v23 }
  0x32   : > { %1109 = vmatmul.msk.f32.gmra.mxu2 %vm467_vm0, %v377_v24  ;;  %1113 = vmatmul.msk.f32.gmra.mxu1 %vm467_vm0, %v373_v23 }
  0x33   : > { %1117 = vmatmul.msk.f32.gmra.mxu3 %vm467_vm0, %v377_v24  ;;  %634 = vperm.xlu1 %1226, %v397_v25  }
  0x34   : > { %639 = vperm.xlu2 %1227, %v398_v26  }
  0x36   : > { %644 = vperm.xlu0 %1225, %v399_v27  }
  0x39   : > { %1106 = vmatmul.msk.f32.gmra.mxu0 %vm467_vm0, %v374_v28 }
  0x3a   : > { %1110 = vmatmul.msk.f32.gmra.mxu2 %vm467_vm0, %v378_v29  ;;  %1114 = vmatmul.msk.f32.gmra.mxu1 %vm467_vm0, %v374_v28 }
  0x3b   : > { %1118 = vmatmul.msk.f32.gmra.mxu3 %vm467_vm0, %v378_v29  ;;  %649 = vperm.xlu1 %1226, %v400_v30  }
  0x3c   : > { %654 = vperm.xlu2 %1227, %v401_v31  }
  0x3e   : > { %659 = vperm.xlu0 %1225, %v402_v32  }
  0x43   : > { %770 = vperm.xlu1 %1226, %v411_v33   ;;  %v387_v33 = vld [vmem:[%s1728_s4] sm:$0xff] }
  0x44   : > { %775 = vperm.xlu2 %1227, %v412_v34  }
  0x46   : > { %780 = vperm.xlu0 %1225, %v413_v35  }
  0x4b   : > { %785 = vperm.xlu1 %1226, %v414_v36  }
  0x4c   : > { %790 = vperm.xlu2 %1227, %v415_v37  }
  0x4e   : > { %795 = vperm.xlu0 %1225, %v416_v38  }
  0x53   : > { %800 = vperm.xlu1 %1226, %v417_v39  }
  0x54   : > { %805 = vperm.xlu2 %1227, %v418_v40  }
  0x72   : > { %v465_v53 = vpop.permute.xlu2 %464 }
  0x7e   : > { %v460_v9 = vpop.permute.xlu2 %459 }
  0x88   : > { %v445_v47 = vpop.permute.xlu0 %444  ;;  %v435_v48 = vpop.permute.xlu1 %434 }
  0x90   : > { %v440_v54 = vpop.permute.xlu0 %439 }
  0x95   : > { %v430_v55 = vpop.permute.xlu1 %429 }
  0x98   : > { %v455_v13 = vpop.permute.xlu0 %454 }
  0x9d   : > { %v450_v17 = vpop.permute.xlu1 %449 }
  0x9e   : > { %v509_v41 = vpop.f32.mrf.mxu0 }
  0x9f   : > { %v550_v42 = vpop.f32.mrf.mxu1  ;;  %v510_v56 = vadd.f32 %v509_v41, %v430_v55 }
  0xa0   : > { %v1531_v57 = vadd.f32 %v550_v42, %v430_v55  ;;  %v390_v55 = vld [vmem:[%s1728_s4 + $0x18] sm:$0xff] }
  0xa1   : > { %vm574_vm1 = vcmp.gt.f32.partialorder %v510_v56, 0.0  ;;  %v590_v4 = vmul.f32 0.1, %v510_v56 }
  0xa2   : > { %vm575_vm3 = vcmp.gt.f32.partialorder %v1531_v57, 0.0  ;;  %v591_v12 = vmul.f32 0.1, %v1531_v57 }
  0xa3   : > { %v606_v21 = vsel %vm574_vm1, %v510_v56, %v590_v4  ;;  %v406_v56 = vld [vmem:[%s1730_s6 + $0x18] sm:$0xff] }
  0xa4   : > { %v607_v37 = vsel %vm575_vm3, %v1531_v57, %v591_v12  ;;  %v391_v57 = vld [vmem:[%s1728_s4 + $0x20] sm:$0xff] }
  0xa5   : > { %v521_v43 = vpop.f32.mrf.mxu2 }
  0xa6   : > { %v562_v44 = vpop.f32.mrf.mxu3  ;;  %v512_v45 = vpop.f32.mrf.mxu0  ;;  %v522_v22 = vadd.f32 %v521_v43, %v450_v17 }
  0xa7   : > { %v553_v46 = vpop.f32.mrf.mxu1  ;;  %v513_v63 = vadd.f32 %v512_v45, %v435_v48  ;;  %v563_v27 = vadd.f32 %v562_v44, %v450_v17 }
  0xa8   : > { %v554_v2 = vadd.f32 %v553_v46, %v435_v48  ;;  %v598_v43 = vmul.f32 0.1, %v522_v22  ;;  %vm582_vm15 = vcmp.gt.f32.partialorder %v522_v22, 0.0  ;;  %v403_v48 = vld [vmem:[%s1730_s6] sm:$0xff] }
  0xa9   : > { %v592_v11 = vmul.f32 0.1, %v513_v63  ;;  %vm576_vm7 = vcmp.gt.f32.partialorder %v513_v63, 0.0  ;;  %v599_v45 = vmul.f32 0.1, %v563_v27  ;;  %vm583_vm1 = vcmp.gt.f32.partialorder %v563_v27, 0.0 }
  0xaa   : > { %v593_v16 = vmul.f32 0.1, %v554_v2  ;;  %vm577_vm8 = vcmp.gt.f32.partialorder %v554_v2, 0.0 }
  0xab   : > { %v608_v30 = vsel %vm576_vm7, %v513_v63, %v592_v11  ;;  %v394_v63 = vld [vmem:[%s1728_s4 + $0x38] sm:$0xff] }
  0xac   : > { %v609_v31 = vsel %vm577_vm8, %v554_v2, %v593_v16  ;;  %v635_v2 = vpop.permute.xlu1 %634 }
  0xad   : > { %v524_v49 = vpop.f32.mrf.mxu2 }
  0xae   : > { %v565_v50 = vpop.f32.mrf.mxu3  ;;  %v515_v51 = vpop.f32.mrf.mxu0  ;;  %v525_v23 = vadd.f32 %v524_v49, %v455_v13  ;;  %v614_v49 = vsel %vm582_vm15, %v522_v22, %v598_v43 }
  0xaf   : > { %v556_v52 = vpop.f32.mrf.mxu1  ;;  %v516_v58 = vadd.f32 %v515_v51, %v440_v54  ;;  %v566_v28 = vadd.f32 %v565_v50, %v455_v13  ;;  %v615_v50 = vsel %vm583_vm1, %v563_v27, %v599_v45  ;;  %v388_v51 = vld [vmem:[%s1728_s4 + $0x8] sm:$0xff] }
  0xb0   : > { %v557_v60 = vadd.f32 %v556_v52, %v440_v54  ;;  %v600_v39 = vmul.f32 0.1, %v525_v23  ;;  %vm584_vm13 = vcmp.gt.f32.partialorder %v525_v23, 0.0  ;;  %v404_v52 = vld [vmem:[%s1730_s6 + $0x8] sm:$0xff]  ;;  %v405_v54 = vld [vmem:[%s1730_s6 + $0x10] sm:$0xff] }
  0xb1   : > { %v594_v6 = vmul.f32 0.1, %v516_v58  ;;  %vm578_vm5 = vcmp.gt.f32.partialorder %v516_v58, 0.0  ;;  %v601_v41 = vmul.f32 0.1, %v566_v28  ;;  %vm585_vm14 = vcmp.gt.f32.partialorder %v566_v28, 0.0 }
  0xb2   : > { %v595_v8 = vmul.f32 0.1, %v557_v60  ;;  %vm579_vm6 = vcmp.gt.f32.partialorder %v557_v60, 0.0  ;;  %v616_v46 = vsel %vm584_vm13, %v525_v23, %v600_v39  ;;  %v915_v13 = vld [vmem:[%s1630_s24 + $0x8] sm:$0xff] }
  0xb3   : > { %v610_v20 = vsel %vm578_vm5, %v516_v58, %v594_v6  ;;  %v407_v58 = vld [vmem:[%s1730_s6 + $0x20] sm:$0xff] }
  0xb4   : > { %v611_v26 = vsel %vm579_vm6, %v557_v60, %v595_v8  ;;  %v408_v60 = vld [vmem:[%s1730_s6 + $0x28] sm:$0xff] }
  0xb5   : > { %v527_v59 = vpop.f32.mrf.mxu2 }
  0xb6   : > { %v568_v61 = vpop.f32.mrf.mxu3  ;;  %v518_v62 = vpop.f32.mrf.mxu0  ;;  %v528_v14 = vadd.f32 %v527_v59, %v460_v9  ;;  %v392_v59 = vld [vmem:[%s1728_s4 + $0x28] sm:$0xff] }
  0xb7   : > { %v519_v0 = vadd.f32 %v518_v62, %v445_v47  ;;  %v559_v1 = vpop.f32.mrf.mxu1  ;;  %v569_v18 = vadd.f32 %v568_v61, %v460_v9  ;;  %v393_v61 = vld [vmem:[%s1728_s4 + $0x30] sm:$0xff]  ;;  %v914_v9 = vld [vmem:[%s1630_s24] sm:$0xff] }
  0xb8   : > { %v560_v3 = vadd.f32 %v559_v1, %v445_v47  ;;  %v602_v34 = vmul.f32 0.1, %v528_v14  ;;  %vm586_vm11 = vcmp.gt.f32.partialorder %v528_v14, 0.0  ;;  %v617_v47 = vsel %vm585_vm14, %v566_v28, %v601_v41  ;;  %v409_v62 = vld [vmem:[%s1730_s6 + $0x30] sm:$0xff]  ;;  %v625_v1 = vpop.permute.xlu2 %624 }
  0xb9   : > { %vm580_vm2 = vcmp.gt.f32.partialorder %v519_v0, 0.0  ;;  %v596_v5 = vmul.f32 0.1, %v519_v0  ;;  %v603_v36 = vmul.f32 0.1, %v569_v18  ;;  %vm587_vm12 = vcmp.gt.f32.partialorder %v569_v18, 0.0 }
  0xba   : > { %vm581_vm4 = vcmp.gt.f32.partialorder %v560_v3, 0.0  ;;  %v597_v7 = vmul.f32 0.1, %v560_v3  ;;  %v618_v42 = vsel %vm586_vm11, %v528_v14, %v602_v34 }
  0xbb   : > { %v612_v10 = vsel %vm580_vm2, %v519_v0, %v596_v5  ;;  %v619_v44 = vsel %vm587_vm12, %v569_v18, %v603_v36  ;;  %v410_v0 = vld [vmem:[%s1730_s6 + $0x38] sm:$0xff]  ;;  %v1624_v5 = vpop.permute.xlu1 %649 }
  0xbc   : > { %698 = vmatpush.msrb.mxu2 %v612_v10  ;;  %v613_v15 = vsel %vm581_vm4, %v560_v3, %v597_v7  ;;  %v630_v3 = vpop.permute.xlu0 %629 }
  0xbd   : > { %v530_v19 = vpop.f32.mrf.mxu2  ;;  %739 = vmatpush.msrb.mxu3 %v613_v15 }
  0xbe   : > { %v531_v24 = vadd.f32 %v530_v19, %v465_v53  ;;  %v571_v25 = vpop.f32.mrf.mxu3  ;;  %699 = vmatpush.msrb.mxu2 %v610_v20 }
  0xbf   : > { %v572_v29 = vadd.f32 %v571_v25, %v465_v53  ;;  %740 = vmatpush.msrb.mxu3 %v611_v26  ;;  %v389_v53 = vld [vmem:[%s1728_s4 + $0x10] sm:$0xff] }
  0xc0   : > { %700 = vmatpush.msrb.mxu2 %v608_v30  ;;  %vm588_vm9 = vcmp.gt.f32.partialorder %v531_v24, 0.0  ;;  %v604_v32 = vmul.f32 0.1, %v531_v24  ;;  %v1622_v4 = vpop.permute.xlu2 %639  ;;  %v916_v25 = vld [vmem:[%s1630_s24 + $0x10] sm:$0xff] }
  0xc1   : > { %741 = vmatpush.msrb.mxu3 %v609_v31  ;;  %vm589_vm10 = vcmp.gt.f32.partialorder %v572_v29, 0.0  ;;  %v605_v35 = vmul.f32 0.1, %v572_v29 }
  0xc2   : > { %701 = vmatpush.msrb.mxu2 %v606_v21  ;;  %v620_v38 = vsel %vm588_vm9, %v531_v24, %v604_v32 }
  0xc3   : > { %742 = vmatpush.msrb.mxu3 %v607_v37  ;;  %844 = vmatpush.msrb.mxu0 %v620_v38  ;;  %v621_v40 = vsel %vm589_vm10, %v572_v29, %v605_v35  ;;  %v771_v15 = vpop.permute.xlu1 %770  ;;  %v917_v29 = vld [vmem:[%s1630_s24 + $0x18] sm:$0xff] }
  0xc4   : > { %885 = vmatpush.msrb.mxu1 %v621_v40  ;;  %1119 = vmatmul.msk.f32.vlgmr.msrb.gmra.mxu2 %vm467_vm0, %v387_v33  ;;  %v1632_v6 = vpop.permute.xlu0 %644  ;;  %v918_v40 = vld [vmem:[%s1630_s24 + $0x20] sm:$0xff] }
  0xc5   : > { %1127 = vmatmul.msk.f32.vlgmr.msrb.gmra.mxu3 %vm467_vm0, %v387_v33  ;;  %845 = vmatpush.msrb.mxu0 %v618_v42 }
  0xc6   : > { %886 = vmatpush.msrb.mxu1 %v619_v44  ;;  %v919_v44 = vld [vmem:[%s1630_s24 + $0x28] sm:$0xff] }
  0xc7   : > { %846 = vmatpush.msrb.mxu0 %v616_v46 }
  0xc8   : > { %887 = vmatpush.msrb.mxu1 %v617_v47  ;;  %v1635_v7 = vpop.permute.xlu2 %654 }
  0xc9   : > { %847 = vmatpush.msrb.mxu0 %v614_v49 }
  0xca   : > { %888 = vmatpush.msrb.mxu1 %v615_v50  ;;  %1135 = vmatmul.msk.f32.vlgmr.msrb.gmra.mxu0 %vm467_vm0, %v403_v48 }
  0xcb   : > { %1143 = vmatmul.msk.f32.vlgmr.msrb.gmra.mxu1 %vm467_vm0, %v403_v48 }
  0xcc   : > { %1120 = vmatmul.msk.f32.gmra.mxu2 %vm467_vm0, %v388_v51  ;;  %v1641_v23 = vpop.permute.xlu0 %659 }
  0xcd   : > { %1128 = vmatmul.msk.f32.gmra.mxu3 %vm467_vm0, %v388_v51 }
  0xd0   : > { %v776_v31 = vpop.permute.xlu2 %775 }
  0xd2   : > { %1136 = vmatmul.msk.f32.gmra.mxu0 %vm467_vm0, %v404_v52 }
  0xd3   : > { %1144 = vmatmul.msk.f32.gmra.mxu1 %vm467_vm0, %v404_v52 }
  0xd4   : > { %1121 = vmatmul.msk.f32.gmra.mxu2 %vm467_vm0, %v389_v53  ;;  %v781_v46 = vpop.permute.xlu0 %780 }
  0xd5   : > { %1129 = vmatmul.msk.f32.gmra.mxu3 %vm467_vm0, %v389_v53 }
  0xda   : > { %1137 = vmatmul.msk.f32.gmra.mxu0 %vm467_vm0, %v405_v54 }
  0xdb   : > { %1145 = vmatmul.msk.f32.gmra.mxu1 %vm467_vm0, %v405_v54 }
  0xdc   : > { %1122 = vmatmul.msk.f32.gmra.mxu2 %vm467_vm0, %v390_v55 }
  0xdd   : > { %1130 = vmatmul.msk.f32.gmra.mxu3 %vm467_vm0, %v390_v55  ;;  %v920_v55 = vld [vmem:[%s1630_s24 + $0x30] sm:$0xff] }
  0xe2   : > { %1138 = vmatmul.msk.f32.gmra.mxu0 %vm467_vm0, %v406_v56 }
  0xe3   : > { %1146 = vmatmul.msk.f32.gmra.mxu1 %vm467_vm0, %v406_v56 }
  0xe4   : > { %1123 = vmatmul.msk.f32.gmra.mxu2 %vm467_vm0, %v391_v57 }
  0xe5   : > { %1131 = vmatmul.msk.f32.gmra.mxu3 %vm467_vm0, %v391_v57 }
  0xea   : > { %1139 = vmatmul.msk.f32.gmra.mxu0 %vm467_vm0, %v407_v58 }
  0xeb   : > { %1147 = vmatmul.msk.f32.gmra.mxu1 %vm467_vm0, %v407_v58 }
  0xec   : > { %1124 = vmatmul.msk.f32.gmra.mxu2 %vm467_vm0, %v392_v59 }
  0xed   : > { %1132 = vmatmul.msk.f32.gmra.mxu3 %vm467_vm0, %v392_v59  ;;  %v921_v59 = vld [vmem:[%s1630_s24 + $0x38] sm:$0xff] }
  0xf2   : > { %1140 = vmatmul.msk.f32.gmra.mxu0 %vm467_vm0, %v408_v60 }
  0xf3   : > { %1148 = vmatmul.msk.f32.gmra.mxu1 %vm467_vm0, %v408_v60 }
  0xf4   : > { %1125 = vmatmul.msk.f32.gmra.mxu2 %vm467_vm0, %v393_v61 }
  0xf5   : > { %1133 = vmatmul.msk.f32.gmra.mxu3 %vm467_vm0, %v393_v61  ;;  %v786_v61 = vpop.permute.xlu1 %785 }
  0xfa   : > { %1141 = vmatmul.msk.f32.gmra.mxu0 %vm467_vm0, %v409_v62 }
  0xfb   : > { %1149 = vmatmul.msk.f32.gmra.mxu1 %vm467_vm0, %v409_v62 }
  0xfc   : > { %1126 = vmatmul.msk.f32.gmra.mxu2 %vm467_vm0, %v394_v63 }
  0xfd   : > { %1134 = vmatmul.msk.f32.gmra.mxu3 %vm467_vm0, %v394_v63 }
 0x102   : > { %1142 = vmatmul.msk.f32.gmra.mxu0 %vm467_vm0, %v410_v0 }
 0x103   : > { %1150 = vmatmul.msk.f32.gmra.mxu1 %vm467_vm0, %v410_v0 }
 0x147   : > { %v703_v8 = vpop.f32.mrf.mxu2  ;;  %v849_v10 = vpop.f32.mrf.mxu0 }
 0x148   : > { %v704_v11 = vadd.f32 %v703_v8, %v625_v1  ;;  %v744_v12 = vpop.f32.mrf.mxu3  ;;  %v890_v14 = vpop.f32.mrf.mxu1  ;;  %v850_v18 = vadd.f32 %v849_v10, %v771_v15  ;;  %v922_v10 = vld [vmem:[%s1630_s24 + $0x40] sm:$0xff] }
 0x149   : > { %v745_v16 = vadd.f32 %v744_v12, %v625_v1  ;;  %v891_v20 = vadd.f32 %v890_v14, %v771_v15  ;;  %v923_v14 = vld [vmem:[%s1630_s24 + $0x48] sm:$0xff] }
 0x14a   : > { %v930_v17 = vmul.f32 %v914_v9, %v704_v11 }
 0x14b   : > { %v931_v19 = vmul.f32 %v915_v13, %v745_v16 }
 0x14c   : > { %v946_v21 = vadd.f32 %v930_v17, %v850_v18 }
 0x14d   : > { %v947_v22 = vadd.f32 %v931_v19, %v891_v20 }
 0x14e   : > { %962 = vst [vmem:[%s1643_s26] sm:$0xff] %v946_v21 }
 0x14f   : > { %963 = vst [vmem:[%s1643_s26 + $0x8] sm:$0xff] %v947_v22  ;;  %v706_v24 = vpop.f32.mrf.mxu2  ;;  %v852_v26 = vpop.f32.mrf.mxu0 }
 0x150   : > { %v707_v27 = vadd.f32 %v706_v24, %v630_v3  ;;  %v747_v28 = vpop.f32.mrf.mxu3  ;;  %v893_v30 = vpop.f32.mrf.mxu1  ;;  %v853_v34 = vadd.f32 %v852_v26, %v776_v31 }
 0x151   : > { %v748_v32 = vadd.f32 %v747_v28, %v630_v3  ;;  %v894_v36 = vadd.f32 %v893_v30, %v776_v31 }
 0x152   : > { %v932_v33 = vmul.f32 %v916_v25, %v707_v27  ;;  %v924_v25 = vld [vmem:[%s1630_s24 + $0x50] sm:$0xff] }
 0x153   : > { %v933_v35 = vmul.f32 %v917_v29, %v748_v32  ;;  %v925_v29 = vld [vmem:[%s1630_s24 + $0x58] sm:$0xff] }
 0x154   : > { %v948_v37 = vadd.f32 %v932_v33, %v853_v34 }
 0x155   : > { %v949_v38 = vadd.f32 %v933_v35, %v894_v36 }
 0x156   : > { %964 = vst [vmem:[%s1643_s26 + $0x10] sm:$0xff] %v948_v37 }
 0x157   : > { %965 = vst [vmem:[%s1643_s26 + $0x18] sm:$0xff] %v949_v38  ;;  %v709_v39 = vpop.f32.mrf.mxu2  ;;  %v855_v41 = vpop.f32.mrf.mxu0 }
 0x158   : > { %v710_v42 = vadd.f32 %v709_v39, %v635_v2  ;;  %v750_v43 = vpop.f32.mrf.mxu3  ;;  %v896_v45 = vpop.f32.mrf.mxu1  ;;  %v856_v49 = vadd.f32 %v855_v41, %v781_v46  ;;  %v926_v39 = vld [vmem:[%s1630_s24 + $0x60] sm:$0xff] }
 0x159   : > { %v751_v47 = vadd.f32 %v750_v43, %v635_v2  ;;  %v897_v51 = vadd.f32 %v896_v45, %v781_v46  ;;  %v927_v43 = vld [vmem:[%s1630_s24 + $0x68] sm:$0xff] }
 0x15a   : > { %v934_v48 = vmul.f32 %v918_v40, %v710_v42 }
 0x15b   : > { %v935_v50 = vmul.f32 %v919_v44, %v751_v47  ;;  %v801_v44 = vpop.permute.xlu1 %800 }
 0x15c   : > { %v950_v52 = vadd.f32 %v934_v48, %v856_v49 }
 0x15d   : > { %v951_v53 = vadd.f32 %v935_v50, %v897_v51 }
 0x15e   : > { %966 = vst [vmem:[%s1643_s26 + $0x20] sm:$0xff] %v950_v52 }
 0x15f   : > { %967 = vst [vmem:[%s1643_s26 + $0x28] sm:$0xff] %v951_v53  ;;  %v712_v54 = vpop.f32.mrf.mxu2  ;;  %v858_v56 = vpop.f32.mrf.mxu0  ;;  %v928_v53 = vld [vmem:[%s1630_s24 + $0x70] sm:$0xff] }
 0x160   : > { %v713_v57 = vadd.f32 %v712_v54, %v1622_v4  ;;  %v753_v58 = vpop.f32.mrf.mxu3  ;;  %v899_v60 = vpop.f32.mrf.mxu1  ;;  %v859_v0 = vadd.f32 %v858_v56, %v786_v61  ;;  %v929_v56 = vld [vmem:[%s1630_s24 + $0x78] sm:$0xff] }
 0x161   : > { %v754_v62 = vadd.f32 %v753_v58, %v1622_v4  ;;  %v900_v2 = vadd.f32 %v899_v60, %v786_v61  ;;  %v791_v4 = vpop.permute.xlu2 %790 }
 0x162   : > { %v936_v63 = vmul.f32 %v920_v55, %v713_v57 }
 0x163   : > { %v937_v1 = vmul.f32 %v921_v59, %v754_v62 }
 0x164   : > { %v952_v3 = vadd.f32 %v936_v63, %v859_v0 }
 0x165   : > { %v953_v8 = vadd.f32 %v937_v1, %v900_v2 }
 0x166   : > { %968 = vst [vmem:[%s1643_s26 + $0x30] sm:$0xff] %v952_v3 }
 0x167   : > { %969 = vst [vmem:[%s1643_s26 + $0x38] sm:$0xff] %v953_v8  ;;  %v715_v9 = vpop.f32.mrf.mxu2  ;;  %v861_v11 = vpop.f32.mrf.mxu0 }
 0x168   : > { %v716_v12 = vadd.f32 %v715_v9, %v1632_v6  ;;  %v756_v13 = vpop.f32.mrf.mxu3  ;;  %v902_v15 = vpop.f32.mrf.mxu1  ;;  %v862_v18 = vadd.f32 %v861_v11, %v791_v4 }
 0x169   : > { %v757_v16 = vadd.f32 %v756_v13, %v1632_v6  ;;  %v903_v20 = vadd.f32 %v902_v15, %v791_v4  ;;  %v796_v6 = vpop.permute.xlu0 %795  ;;  %v806_v58 = vpop.permute.xlu2 %805 }
 0x16a   : > { %v938_v17 = vmul.f32 %v922_v10, %v716_v12 }
 0x16b   : > { %v939_v19 = vmul.f32 %v923_v14, %v757_v16 }
 0x16c   : > { %v954_v21 = vadd.f32 %v938_v17, %v862_v18 }
 0x16d   : > { %v955_v22 = vadd.f32 %v939_v19, %v903_v20 }
 0x16e   : > { %970 = vst [vmem:[%s1643_s26 + $0x40] sm:$0xff] %v954_v21 }
 0x16f   : > { %971 = vst [vmem:[%s1643_s26 + $0x48] sm:$0xff] %v955_v22  ;;  %v718_v24 = vpop.f32.mrf.mxu2  ;;  %v864_v26 = vpop.f32.mrf.mxu0 }
 0x170   : > { %v719_v27 = vadd.f32 %v718_v24, %v1624_v5  ;;  %v759_v28 = vpop.f32.mrf.mxu3  ;;  %v905_v30 = vpop.f32.mrf.mxu1  ;;  %v865_v33 = vadd.f32 %v864_v26, %v796_v6 }
 0x171   : > { %v760_v31 = vadd.f32 %v759_v28, %v1624_v5  ;;  %v906_v35 = vadd.f32 %v905_v30, %v796_v6 }
 0x172   : > { %v940_v32 = vmul.f32 %v924_v25, %v719_v27 }
 0x173   : > { %v941_v34 = vmul.f32 %v925_v29, %v760_v31 }
 0x174   : > { %v956_v36 = vadd.f32 %v940_v32, %v865_v33 }
 0x175   : > { %v957_v37 = vadd.f32 %v941_v34, %v906_v35 }
 0x176   : > { %972 = vst [vmem:[%s1643_s26 + $0x50] sm:$0xff] %v956_v36 }
 0x177   : > { %973 = vst [vmem:[%s1643_s26 + $0x58] sm:$0xff] %v957_v37  ;;  %v721_v38 = vpop.f32.mrf.mxu2  ;;  %v867_v40 = vpop.f32.mrf.mxu0 }
 0x178   : > { %v722_v41 = vadd.f32 %v721_v38, %v1635_v7  ;;  %v762_v42 = vpop.f32.mrf.mxu3  ;;  %v908_v5 = vpop.f32.mrf.mxu1  ;;  %v868_v47 = vadd.f32 %v867_v40, %v801_v44 }
 0x179   : > { %v763_v45 = vadd.f32 %v762_v42, %v1635_v7  ;;  %v909_v49 = vadd.f32 %v908_v5, %v801_v44 }
 0x17a   : > { %v942_v46 = vmul.f32 %v926_v39, %v722_v41 }
 0x17b   : > { %v943_v48 = vmul.f32 %v927_v43, %v763_v45 }
 0x17c   : > { %v958_v50 = vadd.f32 %v942_v46, %v868_v47 }
 0x17d   : > { %v959_v51 = vadd.f32 %v943_v48, %v909_v49 }
 0x17e   : > { %974 = vst [vmem:[%s1643_s26 + $0x60] sm:$0xff] %v958_v50 }
 0x17f   : > { %975 = vst [vmem:[%s1643_s26 + $0x68] sm:$0xff] %v959_v51  ;;  %v724_v52 = vpop.f32.mrf.mxu2  ;;  %v870_v54 = vpop.f32.mrf.mxu0 }
 0x180   : > { %v725_v7 = vadd.f32 %v724_v52, %v1641_v23  ;;  %v765_v55 = vpop.f32.mrf.mxu3  ;;  %v911_v57 = vpop.f32.mrf.mxu1  ;;  %v871_v61 = vadd.f32 %v870_v54, %v806_v58 }
 0x181   : > { %v766_v59 = vadd.f32 %v765_v55, %v1641_v23  ;;  %v912_v63 = vadd.f32 %v911_v57, %v806_v58 }
 0x182   : > { %v944_v60 = vmul.f32 %v928_v53, %v725_v7 }
 0x183   : > { %v945_v62 = vmul.f32 %v929_v56, %v766_v59 }
 0x184   : > { %v960_v0 = vadd.f32 %v944_v60, %v871_v61 }
 0x185   : > { %v961_v1 = vadd.f32 %v945_v62, %v912_v63 }
 0x186   : > { %976 = vst [vmem:[%s1643_s26 + $0x70] sm:$0xff] %v960_v0 }
 0x187   : > { %977 = vst [vmem:[%s1643_s26 + $0x78] sm:$0xff] %v961_v1 }
 0x188   : > { %1255 = shalt.err (!%p1252_p5)
}
 0x189   : > { %s1309_s25 = smov 256   ;;  %s1310_s26 = smov 16  }
 0x18a   : > { %1167 = dma.vmem_to_hbm [thread:$0]  (%p1396_p4), %s994_s30, 2048, %s996_s19, %s979_s20, %s1309_s25, %s1309_s25, %s1310_s26  }
 0x18b PF: > { %p1173_p6 = scmp.ge.s32.totalorder %s1306_s10, 2  ;;  %s1010_s16 = sand.u32 1, %s1286_s27  }
 0x18c   : > { %s1011_s24 = scalar_lea.sflag [#allocation3], %s1010_s16 }
 0x18d   : > { %p1170_p7 = pnand %p1173_p6, %p1403_p8 }
 0x18f   : > { %p1171_p9 = pneg %p1170_p7 }
 0x191   : > { %1281 = dma.done.wait (%p1171_p9), %s1011_s24, 2048  }
 0x192   : > { %1283 = vsyncadd (%p1171_p9), %s1011_s24, 4294965248  ;;  %s21_s10 = sadd.s32 1, %s1306_s10   ;;  %s1735_s27 = smov %s1290_s28 }
 0x193   : > { %p18_p10 = scmp.ge.s32.totalorder %s21_s10, 4   ;;  %s1736_s28 = smov %s1294_s29 }
 0x194   : > { %s1737_s29 = smov %s1409_s18  ;;  %s1738_s30 = smov %s1302_s9 }
 0x195   : > { %s1739_s9 = smov %s1741_s13  ;;  %20 = sbr.rel (!%p18_p10) target bundleno = 4 (0x4), region = 90 }
 0x19a   :  { %1017 = vsyncpa [#allocation3], 1 }
 0x19b   :  { %1019 = vsyncpa [#allocation3 + $0x1], 1 }

</bundles_post_ra>
